<compile_context>
chip_gen: v5e
topology: v5e:2x2
jax: 0.10.0
libtpu: 0.0.40
codegen_flags: <defaults>
</compile_context>

<pallas_src>
import functools

import jax
import jax.numpy as jnp
from jax.experimental import pallas as pl
from jax.experimental.pallas import tpu as pltpu


def _round_up(a, m):
    return -(-a // m) * m


def _temporal_block_kernel(x_ref, w1_ref, w2_ref, p_ref, o_ref, xbuf, hbuf,
                           *, TL, K, dilation, pad, HALO, Bb, do_carry):
    """Channels-first (C on sublanes, L on lanes) fused TCN residual block.

    Grid = (B // Bb, num_L_tiles); the L axis is innermost and sequential so the
    causal halo is carried in VMEM scratch between consecutive L tiles of each
    batch row.

    x_ref : (Bb, Cin, TL)           input tile (native NCL layout)
    w1_ref: (K, 2*Cout, Cin) bf16   conv1 weights tap-major; rows Cout..2*Cout hold
                                    the 1x1 downsample weights on tap K-1 (zeros on
                                    the other taps) -> conv1 + residual in one dot.
    w2_ref: (K, Cout, Cout)  bf16   conv2 weights, tap-major
    p_ref : (Cout, 8) f32           packed per-channel params:
                                    b1, s1, t1, b2, s2, t2, bd, 0
    o_ref : (Bb, Cout, TL)          output tile
    xbuf  : (Bb, Cin,  HALO+TL) bf16  [HALO-pad:HALO]=carried halo, [HALO:]=current
    hbuf  : (Bb, Cout, HALO+TL) bf16  same layout for post-BN1 activations
    """
    t = pl.program_id(1)
    c_in = x_ref.shape[1]
    c_out = o_ref.shape[1]
    off0 = HALO - pad

    if pad > 0:
        @pl.when(t == 0)
        def _init_halo():
            # Causal left zero-padding for the first tile of every sequence.
            xbuf[:, :, :HALO] = jnp.zeros((Bb, c_in, HALO), xbuf.dtype)
            hbuf[:, :, :HALO] = jnp.zeros((Bb, c_out, HALO), hbuf.dtype)

    p = p_ref[...]
    b1, s1, t1 = p[:, 0:1], p[:, 1:2], p[:, 2:3]
    b2, s2, t2 = p[:, 3:4], p[:, 4:5], p[:, 5:6]
    bd = p[:, 6:7]

    for r in range(Bb):
        # Stage the current x tile at a 128-aligned lane offset (unmasked vst).
        xcur = x_ref[r].astype(xbuf.dtype)            # (Cin, TL) bf16
        xbuf[r, :, HALO:] = xcur

        # ---- conv1 (+ fused 1x1 downsample rows): K tap matmuls, f32 accum ----
        acc1 = jnp.dot(w1_ref[0], xbuf[r, :, off0:off0 + TL],
                       preferred_element_type=jnp.float32)
        for j in range(1, K):
            s = off0 + j * dilation
            acc1 += jnp.dot(w1_ref[j], xbuf[r, :, s:s + TL],
                            preferred_element_type=jnp.float32)
        res = acc1[c_out:, :] + bd                    # 1x1 downsample + bias
        h1 = jnp.maximum(acc1[:c_out, :] + b1, 0.0)   # bias + ReLU (dropout1 = id)
        h1 = h1 * s1 + t1                             # BatchNorm1d (eval) affine
        h1b = h1.astype(hbuf.dtype)
        hbuf[r, :, HALO:] = h1b                       # aligned store

        # ---- conv2 over [carried h1 halo | current h1] ----
        acc2 = jnp.dot(w2_ref[0], hbuf[r, :, off0:off0 + TL],
                       preferred_element_type=jnp.float32)
        for j in range(1, K):
            s = off0 + j * dilation
            acc2 += jnp.dot(w2_ref[j], hbuf[r, :, s:s + TL],
                            preferred_element_type=jnp.float32)
        h2 = jnp.maximum(acc2 + b2, 0.0)              # bias + ReLU (dropout2 = id)
        h2 = h2 * s2 + t2                             # norm2

        # ---- residual add + final ReLU ----
        o_ref[r] = jnp.maximum(h2 + res, 0.0).astype(o_ref.dtype)

        # ---- carry the causal halo to this row's next L tile ----
        if do_carry:
            xbuf[r, :, off0:HALO] = xcur[:, TL - pad:]
            hbuf[r, :, off0:HALO] = h1b[:, TL - pad:]


def _fold_bn(gamma, beta, mean, var, eps=1e-5):
    scale = gamma / jnp.sqrt(var + eps)
    shift = beta - mean * scale
    return scale, shift


def temporal_block(x, p, *, kernel_size, dilation, tile_l=None, batch_block=None,
                   eps=1e-5):
    """x: (B, C_in, L) in PyTorch NCL layout. Returns (B, C_out, L), same dtype."""
    B, c_in, L = x.shape
    c_out = p['conv1_w'].shape[0]
    K = kernel_size
    pad = (K - 1) * dilation

    # ---- fold params into kernel layout (tiny one-time host-side work) --------
    s1, t1 = _fold_bn(p['bn1_gamma'], p['bn1_beta'], p['bn1_mean'], p['bn1_var'], eps)
    s2, t2 = _fold_bn(p['bn2_gamma'], p['bn2_beta'], p['bn2_mean'], p['bn2_var'], eps)
    w1k = jnp.transpose(p['conv1_w'], (2, 0, 1))                    # (K, Cout, Cin)
    down = jnp.zeros((K, c_out, c_in), w1k.dtype).at[K - 1].set(p['down_w'][:, :, 0])
    w1f = jnp.concatenate([w1k, down], axis=1).astype(jnp.bfloat16)  # (K, 2*Cout, Cin)
    w2k = jnp.transpose(p['conv2_w'], (2, 0, 1)).astype(jnp.bfloat16)  # (K, Cout, Cout)
    pvec = jnp.stack([p['conv1_b'], s1, t1, p['conv2_b'], s2, t2,
                      p['down_b'], jnp.zeros_like(s1)], axis=1).astype(jnp.float32)

    # ---- L tiling: big lane-dense tiles amortize the per-grid-step overhead ----
    L128 = _round_up(L, 128)
    if tile_l is None:
        # Keep per-step I/O around a few MiB; cap at 4096 lanes.
        target = (8 << 20) // max((c_in + c_out) * 4, 1)
        target = max(128, min(4096, (target // 128) * 128))
        if L128 <= target:
            TL = L128
        else:
            n_t0 = -(-L // target)
            TL = _round_up(-(-L // n_t0), 128)      # minimize trailing-pad waste
        if TL < pad:                                # halo must fit in one tile
            TL = min(L128, _round_up(pad, 128))
    else:
        TL = min(_round_up(int(tile_l), 128), L128)
    n_t = -(-L // TL)
    Lp = n_t * TL
    if n_t > 1:
        assert TL >= pad, "L tile must cover the causal receptive-field halo"
    # Trailing zero-pad only affects discarded trailing outputs (conv is causal).
    xin = x if Lp == L else jnp.pad(x, ((0, 0), (0, 0), (0, Lp - L)))

    # ---- batch blocking: fold Bb rows per grid step -----------------------------
    if batch_block is None:
        io_per_row = (c_in + c_out) * TL * 4 * 2     # double-buffered in+out blocks
        bb_cap = max(1, min(8, (16 << 20) // max(io_per_row, 1)))
    else:
        bb_cap = max(1, int(batch_block))
    Bb = 1
    for d in range(min(B, bb_cap), 0, -1):
        if B % d == 0:
            Bb = d
            break
    nb = B // Bb

    HALO = _round_up(pad, 128) if pad > 0 else 0
    do_carry = (pad > 0) and (n_t > 1)

    # ---- explicit VMEM budget (keeps v7x's 64 MiB safe at large TL*Bb) ---------
    blk_io = 2 * Bb * (c_in + c_out) * TL * 4                  # double-buffered I/O
    stage = Bb * (c_in + c_out) * (HALO + TL) * 2              # bf16 carry/staging
    temps = (c_in + c_out) * TL * 48                           # per-row live temps
    wbytes = (K * 2 * c_out * c_in + K * c_out * c_out + c_out * 8) * 8
    est = blk_io + stage + temps + wbytes + (2 << 20)
    vmem_limit = int(min(48 << 20, max(32 << 20, 2 * est)))

    kernel = functools.partial(_temporal_block_kernel, TL=TL, K=K,
                               dilation=dilation, pad=pad, HALO=HALO, Bb=Bb,
                               do_carry=do_carry)

    out = pl.pallas_call(
        kernel,
        out_shape=jax.ShapeDtypeStruct((B, c_out, Lp), x.dtype),
        grid=(nb, n_t),
        in_specs=[
            pl.BlockSpec((Bb, c_in, TL), lambda b, t: (b, 0, t)),       # x tiles
            pl.BlockSpec((K, 2 * c_out, c_in), lambda b, t: (0, 0, 0)),  # w1+down
            pl.BlockSpec((K, c_out, c_out), lambda b, t: (0, 0, 0)),     # w2
            pl.BlockSpec((c_out, 8), lambda b, t: (0, 0)),               # packed params
        ],
        out_specs=pl.BlockSpec((Bb, c_out, TL), lambda b, t: (b, 0, t)),
        scratch_shapes=[
            pltpu.VMEM((Bb, c_in, HALO + TL), jnp.bfloat16),   # x  stage + carry
            pltpu.VMEM((Bb, c_out, HALO + TL), jnp.bfloat16),  # h1 stage + carry
        ],
        compiler_params=pltpu.CompilerParams(
            # L axis must be sequential for the halo carry; batch blocks parallel.
            dimension_semantics=("parallel", "arbitrary"),
            vmem_limit_bytes=vmem_limit,
        ),
    )(xin, w1f, w2k, pvec)

    return out if Lp == L else out[:, :, :L]


def temporal_block_ref(x, p, *, kernel_size, dilation, eps=1e-5):
    """Pure-JAX f32 reference mirroring the PyTorch module (for correctness)."""
    pad = (kernel_size - 1) * dilation
    B, c_in, L = x.shape

    def causal_conv(h, w, b):                    # h (B,C,L), w (Cout,C,K), b (Cout,)
        hp = jnp.pad(h, ((0, 0), (0, 0), (pad, 0)))
        out = jnp.zeros((B, w.shape[0], L), jnp.float32)
        for j in range(kernel_size):
            out = out + jnp.einsum('bcl,oc->bol',
                                   hp[:, :, j * dilation: j * dilation + L],
                                   w[:, :, j])
        return out + b[None, :, None]

    def bn(h, gamma, beta, mean, var):
        scale = gamma / jnp.sqrt(var + eps)
        return (h - mean[None, :, None]) * scale[None, :, None] + beta[None, :, None]

    h1 = causal_conv(x, p['conv1_w'], p['conv1_b'])
    h1 = bn(jnp.maximum(h1, 0.0), p['bn1_gamma'], p['bn1_beta'],
            p['bn1_mean'], p['bn1_var'])
    h2 = causal_conv(h1, p['conv2_w'], p['conv2_b'])
    h2 = bn(jnp.maximum(h2, 0.0), p['bn2_gamma'], p['bn2_beta'],
            p['bn2_mean'], p['bn2_var'])
    res = jnp.einsum('bcl,oc->bol', x, p['down_w'][:, :, 0]) + p['down_b'][None, :, None]
    return jnp.maximum(h2 + res, 0.0)


def make_params(key, c_in, c_out, kernel_size):
    """Deterministic synthetic parameters in PyTorch-like layout."""
    ks = jax.random.split(key, 14)

    def n(k, shape, s=0.3):
        return s * jax.random.normal(k, shape, jnp.float32)

    return {
        'conv1_w': n(ks[0], (c_out, c_in, kernel_size)),
        'conv1_b': n(ks[1], (c_out,), 0.1),
        'bn1_gamma': 1.0 + n(ks[2], (c_out,), 0.1),
        'bn1_beta': n(ks[3], (c_out,), 0.1),
        'bn1_mean': n(ks[4], (c_out,), 0.1),
        'bn1_var': jnp.abs(1.0 + n(ks[5], (c_out,), 0.1)),
        'conv2_w': n(ks[6], (c_out, c_out, kernel_size)),
        'conv2_b': n(ks[7], (c_out,), 0.1),
        'bn2_gamma': 1.0 + n(ks[8], (c_out,), 0.1),
        'bn2_beta': n(ks[9], (c_out,), 0.1),
        'bn2_mean': n(ks[10], (c_out,), 0.1),
        'bn2_var': jnp.abs(1.0 + n(ks[11], (c_out,), 0.1)),
        'down_w': n(ks[12], (c_out, c_in, 1)),
        'down_b': n(ks[13], (c_out,), 0.1),
    }


if __name__ == "__main__":
    B, C_IN, C_OUT, L = 2, 4, 8, 256          # L = two lane-dense 128 blocks
    KERNEL_SIZE, DILATION = 3, 2

    key = jax.random.PRNGKey(0)
    kx, kp = jax.random.split(key)
    x = jax.random.normal(kx, (B, C_IN, L), jnp.float32)       # (B, C, L) NCL
    params = make_params(kp, C_IN, C_OUT, KERNEL_SIZE)

    out = temporal_block(x, params, kernel_size=KERNEL_SIZE, dilation=DILATION)
    out = jax.block_until_ready(out)

    ref = temporal_block_ref(x, params, kernel_size=KERNEL_SIZE, dilation=DILATION)
    assert out.shape == (B, C_OUT, L)
    # bf16 MXU operands (f32 accumulation) -> bf16-level tolerance vs f32 ref.
    assert jnp.allclose(out, ref, atol=5e-2, rtol=5e-2), "mismatch vs JAX reference"

    print("KERNEL_OK")
</pallas_src>

<mosaic_0001>
module attributes {stable_mosaic.version = 11 : i64} {
  func.func @_temporal_block_kernel(%arg0: i32, %arg1: i32, %arg2: memref<2x4x256xf32, #tpu.memory_space<vmem>>, %arg3: memref<3x16x4xbf16, #tpu.memory_space<vmem>>, %arg4: memref<3x8x8xbf16, #tpu.memory_space<vmem>>, %arg5: memref<8x8xf32, #tpu.memory_space<vmem>>, %arg6: memref<2x8x256xf32, #tpu.memory_space<vmem>>, %arg7: memref<2x4x384xbf16, #tpu.memory_space<vmem>>, %arg8: memref<2x8x384xbf16, #tpu.memory_space<vmem>>) attributes {dimension_semantics = [#tpu.dimension_semantics<parallel>, #tpu.dimension_semantics<arbitrary>], iteration_bounds = array<i64: 1, 1>, scalar_prefetch = 0 : i64, scratch_operands = 2 : i64, tpu.core_type = #tpu.core_type<tc>, window_params = [{transform_indices = @transform_0, window_bounds = array<i64: 2, 4, 256>}, {pipeline_mode = #tpu.pipeline_mode<synchronous>, transform_indices = @transform_1, window_bounds = array<i64: 3, 16, 4>}, {pipeline_mode = #tpu.pipeline_mode<synchronous>, transform_indices = @transform_2, window_bounds = array<i64: 3, 8, 8>}, {pipeline_mode = #tpu.pipeline_mode<synchronous>, transform_indices = @transform_3, window_bounds = array<i64: 8, 8>}, {transform_indices = @transform_4, window_bounds = array<i64: 2, 8, 256>}]} {
    %c0_i32 = arith.constant 0 : i32
    %0 = arith.cmpi eq, %arg1, %c0_i32 : i32
    %1 = arith.extui %0 : i1 to i32
    %c0_i32_0 = arith.constant 0 : i32
    %2 = arith.cmpi ne, %1, %c0_i32_0 : i32
    scf.if %2 {
      %cst_110 = arith.constant 0.000000e+00 : bf16
      %151 = vector.broadcast %cst_110 : bf16 to vector<2x4x128xbf16>
      %c0_111 = arith.constant 0 : index
      %c0_112 = arith.constant 0 : index
      %c0_113 = arith.constant 0 : index
      %152 = vector.load %arg7[%c0_111, %c0_112, %c0_113] : memref<2x4x384xbf16, #tpu.memory_space<vmem>>, vector<2x4x128xbf16>
      tpu.vector_store %arg7[%c0_111, %c0_112, %c0_113], %151 {strides = array<i32>} : memref<2x4x384xbf16, #tpu.memory_space<vmem>>, vector<2x4x128xbf16>,
      %cst_114 = arith.constant 0.000000e+00 : bf16
      %153 = vector.broadcast %cst_114 : bf16 to vector<2x8x128xbf16>
      %c0_115 = arith.constant 0 : index
      %c0_116 = arith.constant 0 : index
      %c0_117 = arith.constant 0 : index
      %154 = vector.load %arg8[%c0_115, %c0_116, %c0_117] : memref<2x8x384xbf16, #tpu.memory_space<vmem>>, vector<2x8x128xbf16>
      tpu.vector_store %arg8[%c0_115, %c0_116, %c0_117], %153 {strides = array<i32>} : memref<2x8x384xbf16, #tpu.memory_space<vmem>>, vector<2x8x128xbf16>,
    } else {
    }
    %c0 = arith.constant 0 : index
    %c0_1 = arith.constant 0 : index
    %3 = vector.load %arg5[%c0, %c0_1] : memref<8x8xf32, #tpu.memory_space<vmem>>, vector<8x8xf32>
    %4 = vector.extract_strided_slice %3 {offsets = [0, 0], sizes = [8, 1], strides = [1, 1]} : vector<8x8xf32> to vector<8x1xf32>
    %5 = vector.extract_strided_slice %3 {offsets = [0, 1], sizes = [8, 1], strides = [1, 1]} : vector<8x8xf32> to vector<8x1xf32>
    %6 = vector.extract_strided_slice %3 {offsets = [0, 2], sizes = [8, 1], strides = [1, 1]} : vector<8x8xf32> to vector<8x1xf32>
    %7 = vector.extract_strided_slice %3 {offsets = [0, 3], sizes = [8, 1], strides = [1, 1]} : vector<8x8xf32> to vector<8x1xf32>
    %8 = vector.extract_strided_slice %3 {offsets = [0, 4], sizes = [8, 1], strides = [1, 1]} : vector<8x8xf32> to vector<8x1xf32>
    %9 = vector.extract_strided_slice %3 {offsets = [0, 5], sizes = [8, 1], strides = [1, 1]} : vector<8x8xf32> to vector<8x1xf32>
    %10 = vector.extract_strided_slice %3 {offsets = [0, 6], sizes = [8, 1], strides = [1, 1]} : vector<8x8xf32> to vector<8x1xf32>
    %c0_2 = arith.constant 0 : index
    %c0_3 = arith.constant 0 : index
    %c0_4 = arith.constant 0 : index
    %11 = vector.load %arg2[%c0_2, %c0_3, %c0_4] : memref<2x4x256xf32, #tpu.memory_space<vmem>>, vector<1x4x256xf32>
    %12 = vector.shape_cast %11 : vector<1x4x256xf32> to vector<4x256xf32>
    %13 = arith.truncf %12 : vector<4x256xf32> to vector<4x256xbf16>
    %c0_5 = arith.constant 0 : index
    %c0_6 = arith.constant 0 : index
    %c128 = arith.constant 128 : index
    %14 = vector.load %arg7[%c0_5, %c0_6, %c128] : memref<2x4x384xbf16, #tpu.memory_space<vmem>>, vector<1x4x256xbf16>
    %15 = vector.shape_cast %14 : vector<1x4x256xbf16> to vector<4x256xbf16>
    %16 = vector.shape_cast %13 : vector<4x256xbf16> to vector<1x4x256xbf16>
    tpu.vector_store %arg7[%c0_5, %c0_6, %c128], %16 {strides = array<i32>} : memref<2x4x384xbf16, #tpu.memory_space<vmem>>, vector<1x4x256xbf16>,
    %c0_7 = arith.constant 0 : index
    %c0_8 = arith.constant 0 : index
    %c0_9 = arith.constant 0 : index
    %17 = vector.load %arg3[%c0_7, %c0_8, %c0_9] : memref<3x16x4xbf16, #tpu.memory_space<vmem>>, vector<1x16x4xbf16>
    %18 = vector.shape_cast %17 : vector<1x16x4xbf16> to vector<16x4xbf16>
    %c0_10 = arith.constant 0 : index
    %c0_11 = arith.constant 0 : index
    %c124 = arith.constant 124 : index
    %19 = vector.load %arg7[%c0_10, %c0_11, %c124] : memref<2x4x384xbf16, #tpu.memory_space<vmem>>, vector<1x4x256xbf16>
    %20 = vector.shape_cast %19 : vector<1x4x256xbf16> to vector<4x256xbf16>
    %cst = arith.constant dense<0.000000e+00> : vector<16x256xf32>
    %21 = tpu.matmul %18, %20, %cst {dimension_numbers = #tpu.dot_dimension_numbers<[1], [0], [0], [1], [0, 0, 1, 1], [], []>} : vector<16x4xbf16>, vector<4x256xbf16>, vector<16x256xf32> -> vector<16x256xf32>
    %c1 = arith.constant 1 : index
    %c0_12 = arith.constant 0 : index
    %c0_13 = arith.constant 0 : index
    %22 = vector.load %arg3[%c1, %c0_12, %c0_13] : memref<3x16x4xbf16, #tpu.memory_space<vmem>>, vector<1x16x4xbf16>
    %23 = vector.shape_cast %22 : vector<1x16x4xbf16> to vector<16x4xbf16>
    %c0_14 = arith.constant 0 : index
    %c0_15 = arith.constant 0 : index
    %c126 = arith.constant 126 : index
    %24 = vector.load %arg7[%c0_14, %c0_15, %c126] : memref<2x4x384xbf16, #tpu.memory_space<vmem>>, vector<1x4x256xbf16>
    %25 = vector.shape_cast %24 : vector<1x4x256xbf16> to vector<4x256xbf16>
    %cst_16 = arith.constant dense<0.000000e+00> : vector<16x256xf32>
    %26 = tpu.matmul %23, %25, %cst_16 {dimension_numbers = #tpu.dot_dimension_numbers<[1], [0], [0], [1], [0, 0, 1, 1], [], []>} : vector<16x4xbf16>, vector<4x256xbf16>, vector<16x256xf32> -> vector<16x256xf32>
    %27 = arith.addf %21, %26 : vector<16x256xf32>
    %c2 = arith.constant 2 : index
    %c0_17 = arith.constant 0 : index
    %c0_18 = arith.constant 0 : index
    %28 = vector.load %arg3[%c2, %c0_17, %c0_18] : memref<3x16x4xbf16, #tpu.memory_space<vmem>>, vector<1x16x4xbf16>
    %29 = vector.shape_cast %28 : vector<1x16x4xbf16> to vector<16x4xbf16>
    %c0_19 = arith.constant 0 : index
    %c0_20 = arith.constant 0 : index
    %c128_21 = arith.constant 128 : index
    %30 = vector.load %arg7[%c0_19, %c0_20, %c128_21] : memref<2x4x384xbf16, #tpu.memory_space<vmem>>, vector<1x4x256xbf16>
    %31 = vector.shape_cast %30 : vector<1x4x256xbf16> to vector<4x256xbf16>
    %cst_22 = arith.constant dense<0.000000e+00> : vector<16x256xf32>
    %32 = tpu.matmul %29, %31, %cst_22 {dimension_numbers = #tpu.dot_dimension_numbers<[1], [0], [0], [1], [0, 0, 1, 1], [], []>} : vector<16x4xbf16>, vector<4x256xbf16>, vector<16x256xf32> -> vector<16x256xf32>
    %33 = arith.addf %27, %32 : vector<16x256xf32>
    %34 = vector.extract_strided_slice %33 {offsets = [8, 0], sizes = [8, 256], strides = [1, 1]} : vector<16x256xf32> to vector<8x256xf32>
    %35 = vector.broadcast %10 : vector<8x1xf32> to vector<8x256xf32>
    %36 = arith.addf %34, %35 : vector<8x256xf32>
    %37 = vector.extract_strided_slice %33 {offsets = [0, 0], sizes = [8, 256], strides = [1, 1]} : vector<16x256xf32> to vector<8x256xf32>
    %38 = vector.broadcast %4 : vector<8x1xf32> to vector<8x256xf32>
    %39 = arith.addf %37, %38 : vector<8x256xf32>
    %cst_23 = arith.constant 0.000000e+00 : f32
    %40 = vector.broadcast %cst_23 : f32 to vector<8x256xf32>
    %41 = arith.maximumf %39, %40 : vector<8x256xf32>
    %42 = vector.broadcast %5 : vector<8x1xf32> to vector<8x256xf32>
    %43 = arith.mulf %41, %42 : vector<8x256xf32>
    %44 = vector.broadcast %6 : vector<8x1xf32> to vector<8x256xf32>
    %45 = arith.addf %43, %44 : vector<8x256xf32>
    %46 = arith.truncf %45 : vector<8x256xf32> to vector<8x256xbf16>
    %c0_24 = arith.constant 0 : index
    %c0_25 = arith.constant 0 : index
    %c128_26 = arith.constant 128 : index
    %47 = vector.load %arg8[%c0_24, %c0_25, %c128_26] : memref<2x8x384xbf16, #tpu.memory_space<vmem>>, vector<1x8x256xbf16>
    %48 = vector.shape_cast %47 : vector<1x8x256xbf16> to vector<8x256xbf16>
    %49 = vector.shape_cast %46 : vector<8x256xbf16> to vector<1x8x256xbf16>
    tpu.vector_store %arg8[%c0_24, %c0_25, %c128_26], %49 {strides = array<i32>} : memref<2x8x384xbf16, #tpu.memory_space<vmem>>, vector<1x8x256xbf16>,
    %c0_27 = arith.constant 0 : index
    %c0_28 = arith.constant 0 : index
    %c0_29 = arith.constant 0 : index
    %50 = vector.load %arg4[%c0_27, %c0_28, %c0_29] : memref<3x8x8xbf16, #tpu.memory_space<vmem>>, vector<1x8x8xbf16>
    %51 = vector.shape_cast %50 : vector<1x8x8xbf16> to vector<8x8xbf16>
    %c0_30 = arith.constant 0 : index
    %c0_31 = arith.constant 0 : index
    %c124_32 = arith.constant 124 : index
    %52 = vector.load %arg8[%c0_30, %c0_31, %c124_32] : memref<2x8x384xbf16, #tpu.memory_space<vmem>>, vector<1x8x256xbf16>
    %53 = vector.shape_cast %52 : vector<1x8x256xbf16> to vector<8x256xbf16>
    %cst_33 = arith.constant dense<0.000000e+00> : vector<8x256xf32>
    %54 = tpu.matmul %51, %53, %cst_33 {dimension_numbers = #tpu.dot_dimension_numbers<[1], [0], [0], [1], [0, 0, 1, 1], [], []>} : vector<8x8xbf16>, vector<8x256xbf16>, vector<8x256xf32> -> vector<8x256xf32>
    %c1_34 = arith.constant 1 : index
    %c0_35 = arith.constant 0 : index
    %c0_36 = arith.constant 0 : index
    %55 = vector.load %arg4[%c1_34, %c0_35, %c0_36] : memref<3x8x8xbf16, #tpu.memory_space<vmem>>, vector<1x8x8xbf16>
    %56 = vector.shape_cast %55 : vector<1x8x8xbf16> to vector<8x8xbf16>
    %c0_37 = arith.constant 0 : index
    %c0_38 = arith.constant 0 : index
    %c126_39 = arith.constant 126 : index
    %57 = vector.load %arg8[%c0_37, %c0_38, %c126_39] : memref<2x8x384xbf16, #tpu.memory_space<vmem>>, vector<1x8x256xbf16>
    %58 = vector.shape_cast %57 : vector<1x8x256xbf16> to vector<8x256xbf16>
    %cst_40 = arith.constant dense<0.000000e+00> : vector<8x256xf32>
    %59 = tpu.matmul %56, %58, %cst_40 {dimension_numbers = #tpu.dot_dimension_numbers<[1], [0], [0], [1], [0, 0, 1, 1], [], []>} : vector<8x8xbf16>, vector<8x256xbf16>, vector<8x256xf32> -> vector<8x256xf32>
    %60 = arith.addf %54, %59 : vector<8x256xf32>
    %c2_41 = arith.constant 2 : index
    %c0_42 = arith.constant 0 : index
    %c0_43 = arith.constant 0 : index
    %61 = vector.load %arg4[%c2_41, %c0_42, %c0_43] : memref<3x8x8xbf16, #tpu.memory_space<vmem>>, vector<1x8x8xbf16>
    %62 = vector.shape_cast %61 : vector<1x8x8xbf16> to vector<8x8xbf16>
    %c0_44 = arith.constant 0 : index
    %c0_45 = arith.constant 0 : index
    %c128_46 = arith.constant 128 : index
    %63 = vector.load %arg8[%c0_44, %c0_45, %c128_46] : memref<2x8x384xbf16, #tpu.memory_space<vmem>>, vector<1x8x256xbf16>
    %64 = vector.shape_cast %63 : vector<1x8x256xbf16> to vector<8x256xbf16>
    %cst_47 = arith.constant dense<0.000000e+00> : vector<8x256xf32>
    %65 = tpu.matmul %62, %64, %cst_47 {dimension_numbers = #tpu.dot_dimension_numbers<[1], [0], [0], [1], [0, 0, 1, 1], [], []>} : vector<8x8xbf16>, vector<8x256xbf16>, vector<8x256xf32> -> vector<8x256xf32>
    %66 = arith.addf %60, %65 : vector<8x256xf32>
    %67 = vector.broadcast %7 : vector<8x1xf32> to vector<8x256xf32>
    %68 = arith.addf %66, %67 : vector<8x256xf32>
    %cst_48 = arith.constant 0.000000e+00 : f32
    %69 = vector.broadcast %cst_48 : f32 to vector<8x256xf32>
    %70 = arith.maximumf %68, %69 : vector<8x256xf32>
    %71 = vector.broadcast %8 : vector<8x1xf32> to vector<8x256xf32>
    %72 = arith.mulf %70, %71 : vector<8x256xf32>
    %73 = vector.broadcast %9 : vector<8x1xf32> to vector<8x256xf32>
    %74 = arith.addf %72, %73 : vector<8x256xf32>
    %75 = arith.addf %74, %36 : vector<8x256xf32>
    %cst_49 = arith.constant 0.000000e+00 : f32
    %76 = vector.broadcast %cst_49 : f32 to vector<8x256xf32>
    %77 = arith.maximumf %75, %76 : vector<8x256xf32>
    %c0_50 = arith.constant 0 : index
    %c0_51 = arith.constant 0 : index
    %c0_52 = arith.constant 0 : index
    %78 = vector.load %arg6[%c0_50, %c0_51, %c0_52] : memref<2x8x256xf32, #tpu.memory_space<vmem>>, vector<1x8x256xf32>
    %79 = vector.shape_cast %78 : vector<1x8x256xf32> to vector<8x256xf32>
    %80 = vector.shape_cast %77 : vector<8x256xf32> to vector<1x8x256xf32>
    tpu.vector_store %arg6[%c0_50, %c0_51, %c0_52], %80 {strides = array<i32>} : memref<2x8x256xf32, #tpu.memory_space<vmem>>, vector<1x8x256xf32>,
    %c1_53 = arith.constant 1 : index
    %c0_54 = arith.constant 0 : index
    %c0_55 = arith.constant 0 : index
    %81 = vector.load %arg2[%c1_53, %c0_54, %c0_55] : memref<2x4x256xf32, #tpu.memory_space<vmem>>, vector<1x4x256xf32>
    %82 = vector.shape_cast %81 : vector<1x4x256xf32> to vector<4x256xf32>
    %83 = arith.truncf %82 : vector<4x256xf32> to vector<4x256xbf16>
    %c1_56 = arith.constant 1 : index
    %c0_57 = arith.constant 0 : index
    %c128_58 = arith.constant 128 : index
    %84 = vector.load %arg7[%c1_56, %c0_57, %c128_58] : memref<2x4x384xbf16, #tpu.memory_space<vmem>>, vector<1x4x256xbf16>
    %85 = vector.shape_cast %84 : vector<1x4x256xbf16> to vector<4x256xbf16>
    %86 = vector.shape_cast %83 : vector<4x256xbf16> to vector<1x4x256xbf16>
    tpu.vector_store %arg7[%c1_56, %c0_57, %c128_58], %86 {strides = array<i32>} : memref<2x4x384xbf16, #tpu.memory_space<vmem>>, vector<1x4x256xbf16>,
    %c0_59 = arith.constant 0 : index
    %c0_60 = arith.constant 0 : index
    %c0_61 = arith.constant 0 : index
    %87 = vector.load %arg3[%c0_59, %c0_60, %c0_61] : memref<3x16x4xbf16, #tpu.memory_space<vmem>>, vector<1x16x4xbf16>
    %88 = vector.shape_cast %87 : vector<1x16x4xbf16> to vector<16x4xbf16>
    %c1_62 = arith.constant 1 : index
    %c0_63 = arith.constant 0 : index
    %c124_64 = arith.constant 124 : index
    %89 = vector.load %arg7[%c1_62, %c0_63, %c124_64] : memref<2x4x384xbf16, #tpu.memory_space<vmem>>, vector<1x4x256xbf16>
    %90 = vector.shape_cast %89 : vector<1x4x256xbf16> to vector<4x256xbf16>
    %cst_65 = arith.constant dense<0.000000e+00> : vector<16x256xf32>
    %91 = tpu.matmul %88, %90, %cst_65 {dimension_numbers = #tpu.dot_dimension_numbers<[1], [0], [0], [1], [0, 0, 1, 1], [], []>} : vector<16x4xbf16>, vector<4x256xbf16>, vector<16x256xf32> -> vector<16x256xf32>
    %c1_66 = arith.constant 1 : index
    %c0_67 = arith.constant 0 : index
    %c0_68 = arith.constant 0 : index
    %92 = vector.load %arg3[%c1_66, %c0_67, %c0_68] : memref<3x16x4xbf16, #tpu.memory_space<vmem>>, vector<1x16x4xbf16>
    %93 = vector.shape_cast %92 : vector<1x16x4xbf16> to vector<16x4xbf16>
    %c1_69 = arith.constant 1 : index
    %c0_70 = arith.constant 0 : index
    %c126_71 = arith.constant 126 : index
    %94 = vector.load %arg7[%c1_69, %c0_70, %c126_71] : memref<2x4x384xbf16, #tpu.memory_space<vmem>>, vector<1x4x256xbf16>
    %95 = vector.shape_cast %94 : vector<1x4x256xbf16> to vector<4x256xbf16>
    %cst_72 = arith.constant dense<0.000000e+00> : vector<16x256xf32>
    %96 = tpu.matmul %93, %95, %cst_72 {dimension_numbers = #tpu.dot_dimension_numbers<[1], [0], [0], [1], [0, 0, 1, 1], [], []>} : vector<16x4xbf16>, vector<4x256xbf16>, vector<16x256xf32> -> vector<16x256xf32>
    %97 = arith.addf %91, %96 : vector<16x256xf32>
    %c2_73 = arith.constant 2 : index
    %c0_74 = arith.constant 0 : index
    %c0_75 = arith.constant 0 : index
    %98 = vector.load %arg3[%c2_73, %c0_74, %c0_75] : memref<3x16x4xbf16, #tpu.memory_space<vmem>>, vector<1x16x4xbf16>
    %99 = vector.shape_cast %98 : vector<1x16x4xbf16> to vector<16x4xbf16>
    %c1_76 = arith.constant 1 : index
    %c0_77 = arith.constant 0 : index
    %c128_78 = arith.constant 128 : index
    %100 = vector.load %arg7[%c1_76, %c0_77, %c128_78] : memref<2x4x384xbf16, #tpu.memory_space<vmem>>, vector<1x4x256xbf16>
    %101 = vector.shape_cast %100 : vector<1x4x256xbf16> to vector<4x256xbf16>
    %cst_79 = arith.constant dense<0.000000e+00> : vector<16x256xf32>
    %102 = tpu.matmul %99, %101, %cst_79 {dimension_numbers = #tpu.dot_dimension_numbers<[1], [0], [0], [1], [0, 0, 1, 1], [], []>} : vector<16x4xbf16>, vector<4x256xbf16>, vector<16x256xf32> -> vector<16x256xf32>
    %103 = arith.addf %97, %102 : vector<16x256xf32>
    %104 = vector.extract_strided_slice %103 {offsets = [8, 0], sizes = [8, 256], strides = [1, 1]} : vector<16x256xf32> to vector<8x256xf32>
    %105 = vector.broadcast %10 : vector<8x1xf32> to vector<8x256xf32>
    %106 = arith.addf %104, %105 : vector<8x256xf32>
    %107 = vector.extract_strided_slice %103 {offsets = [0, 0], sizes = [8, 256], strides = [1, 1]} : vector<16x256xf32> to vector<8x256xf32>
    %108 = vector.broadcast %4 : vector<8x1xf32> to vector<8x256xf32>
    %109 = arith.addf %107, %108 : vector<8x256xf32>
    %cst_80 = arith.constant 0.000000e+00 : f32
    %110 = vector.broadcast %cst_80 : f32 to vector<8x256xf32>
    %111 = arith.maximumf %109, %110 : vector<8x256xf32>
    %112 = vector.broadcast %5 : vector<8x1xf32> to vector<8x256xf32>
    %113 = arith.mulf %111, %112 : vector<8x256xf32>
    %114 = vector.broadcast %6 : vector<8x1xf32> to vector<8x256xf32>
    %115 = arith.addf %113, %114 : vector<8x256xf32>
    %116 = arith.truncf %115 : vector<8x256xf32> to vector<8x256xbf16>
    %c1_81 = arith.constant 1 : index
    %c0_82 = arith.constant 0 : index
    %c128_83 = arith.constant 128 : index
    %117 = vector.load %arg8[%c1_81, %c0_82, %c128_83] : memref<2x8x384xbf16, #tpu.memory_space<vmem>>, vector<1x8x256xbf16>
    %118 = vector.shape_cast %117 : vector<1x8x256xbf16> to vector<8x256xbf16>
    %119 = vector.shape_cast %116 : vector<8x256xbf16> to vector<1x8x256xbf16>
    tpu.vector_store %arg8[%c1_81, %c0_82, %c128_83], %119 {strides = array<i32>} : memref<2x8x384xbf16, #tpu.memory_space<vmem>>, vector<1x8x256xbf16>,
    %c0_84 = arith.constant 0 : index
    %c0_85 = arith.constant 0 : index
    %c0_86 = arith.constant 0 : index
    %120 = vector.load %arg4[%c0_84, %c0_85, %c0_86] : memref<3x8x8xbf16, #tpu.memory_space<vmem>>, vector<1x8x8xbf16>
    %121 = vector.shape_cast %120 : vector<1x8x8xbf16> to vector<8x8xbf16>
    %c1_87 = arith.constant 1 : index
    %c0_88 = arith.constant 0 : index
    %c124_89 = arith.constant 124 : index
    %122 = vector.load %arg8[%c1_87, %c0_88, %c124_89] : memref<2x8x384xbf16, #tpu.memory_space<vmem>>, vector<1x8x256xbf16>
    %123 = vector.shape_cast %122 : vector<1x8x256xbf16> to vector<8x256xbf16>
    %cst_90 = arith.constant dense<0.000000e+00> : vector<8x256xf32>
    %124 = tpu.matmul %121, %123, %cst_90 {dimension_numbers = #tpu.dot_dimension_numbers<[1], [0], [0], [1], [0, 0, 1, 1], [], []>} : vector<8x8xbf16>, vector<8x256xbf16>, vector<8x256xf32> -> vector<8x256xf32>
    %c1_91 = arith.constant 1 : index
    %c0_92 = arith.constant 0 : index
    %c0_93 = arith.constant 0 : index
    %125 = vector.load %arg4[%c1_91, %c0_92, %c0_93] : memref<3x8x8xbf16, #tpu.memory_space<vmem>>, vector<1x8x8xbf16>
    %126 = vector.shape_cast %125 : vector<1x8x8xbf16> to vector<8x8xbf16>
    %c1_94 = arith.constant 1 : index
    %c0_95 = arith.constant 0 : index
    %c126_96 = arith.constant 126 : index
    %127 = vector.load %arg8[%c1_94, %c0_95, %c126_96] : memref<2x8x384xbf16, #tpu.memory_space<vmem>>, vector<1x8x256xbf16>
    %128 = vector.shape_cast %127 : vector<1x8x256xbf16> to vector<8x256xbf16>
    %cst_97 = arith.constant dense<0.000000e+00> : vector<8x256xf32>
    %129 = tpu.matmul %126, %128, %cst_97 {dimension_numbers = #tpu.dot_dimension_numbers<[1], [0], [0], [1], [0, 0, 1, 1], [], []>} : vector<8x8xbf16>, vector<8x256xbf16>, vector<8x256xf32> -> vector<8x256xf32>
    %130 = arith.addf %124, %129 : vector<8x256xf32>
    %c2_98 = arith.constant 2 : index
    %c0_99 = arith.constant 0 : index
    %c0_100 = arith.constant 0 : index
    %131 = vector.load %arg4[%c2_98, %c0_99, %c0_100] : memref<3x8x8xbf16, #tpu.memory_space<vmem>>, vector<1x8x8xbf16>
    %132 = vector.shape_cast %131 : vector<1x8x8xbf16> to vector<8x8xbf16>
    %c1_101 = arith.constant 1 : index
    %c0_102 = arith.constant 0 : index
    %c128_103 = arith.constant 128 : index
    %133 = vector.load %arg8[%c1_101, %c0_102, %c128_103] : memref<2x8x384xbf16, #tpu.memory_space<vmem>>, vector<1x8x256xbf16>
    %134 = vector.shape_cast %133 : vector<1x8x256xbf16> to vector<8x256xbf16>
    %cst_104 = arith.constant dense<0.000000e+00> : vector<8x256xf32>
    %135 = tpu.matmul %132, %134, %cst_104 {dimension_numbers = #tpu.dot_dimension_numbers<[1], [0], [0], [1], [0, 0, 1, 1], [], []>} : vector<8x8xbf16>, vector<8x256xbf16>, vector<8x256xf32> -> vector<8x256xf32>
    %136 = arith.addf %130, %135 : vector<8x256xf32>
    %137 = vector.broadcast %7 : vector<8x1xf32> to vector<8x256xf32>
    %138 = arith.addf %136, %137 : vector<8x256xf32>
    %cst_105 = arith.constant 0.000000e+00 : f32
    %139 = vector.broadcast %cst_105 : f32 to vector<8x256xf32>
    %140 = arith.maximumf %138, %139 : vector<8x256xf32>
    %141 = vector.broadcast %8 : vector<8x1xf32> to vector<8x256xf32>
    %142 = arith.mulf %140, %141 : vector<8x256xf32>
    %143 = vector.broadcast %9 : vector<8x1xf32> to vector<8x256xf32>
    %144 = arith.addf %142, %143 : vector<8x256xf32>
    %145 = arith.addf %144, %106 : vector<8x256xf32>
    %cst_106 = arith.constant 0.000000e+00 : f32
    %146 = vector.broadcast %cst_106 : f32 to vector<8x256xf32>
    %147 = arith.maximumf %145, %146 : vector<8x256xf32>
    %c1_107 = arith.constant 1 : index
    %c0_108 = arith.constant 0 : index
    %c0_109 = arith.constant 0 : index
    %148 = vector.load %arg6[%c1_107, %c0_108, %c0_109] : memref<2x8x256xf32, #tpu.memory_space<vmem>>, vector<1x8x256xf32>
    %149 = vector.shape_cast %148 : vector<1x8x256xf32> to vector<8x256xf32>
    %150 = vector.shape_cast %147 : vector<8x256xf32> to vector<1x8x256xf32>
    tpu.vector_store %arg6[%c1_107, %c0_108, %c0_109], %150 {strides = array<i32>} : memref<2x8x256xf32, #tpu.memory_space<vmem>>, vector<1x8x256xf32>,
    return
  }
  func.func @transform_0(%arg0: i32, %arg1: i32) -> (i32, i32, i32) {
    %c0_i32 = arith.constant 0 : i32
    %c0_i32_0 = arith.constant 0 : i32
    return %arg0, %c0_i32, %arg1 : i32, i32, i32
  }
  func.func @transform_1(%arg0: i32, %arg1: i32) -> (i32, i32, i32) {
    %c0_i32 = arith.constant 0 : i32
    %c0_i32_0 = arith.constant 0 : i32
    %c0_i32_1 = arith.constant 0 : i32
    %c0_i32_2 = arith.constant 0 : i32
    return %c0_i32, %c0_i32_0, %c0_i32_1 : i32, i32, i32
  }
  func.func @transform_2(%arg0: i32, %arg1: i32) -> (i32, i32, i32) {
    %c0_i32 = arith.constant 0 : i32
    %c0_i32_0 = arith.constant 0 : i32
    %c0_i32_1 = arith.constant 0 : i32
    %c0_i32_2 = arith.constant 0 : i32
    return %c0_i32, %c0_i32_0, %c0_i32_1 : i32, i32, i32
  }
  func.func @transform_3(%arg0: i32, %arg1: i32) -> (i32, i32) {
    %c0_i32 = arith.constant 0 : i32
    %c0_i32_0 = arith.constant 0 : i32
    %c0_i32_1 = arith.constant 0 : i32
    return %c0_i32, %c0_i32_0 : i32, i32
  }
  func.func @transform_4(%arg0: i32, %arg1: i32) -> (i32, i32, i32) {
    %c0_i32 = arith.constant 0 : i32
    %c0_i32_0 = arith.constant 0 : i32
    return %arg0, %c0_i32, %arg1 : i32, i32, i32
  }
}

</mosaic_0001>

<bundles_post_ra>
// kernel: tpu_custom_call.1
= control target key start
LH: loop header
LB: loop body
LE: loop exit
PB: predicated region body
PF: predicated region fallthrough
CT: control target
= control target key end

     0   :  { %9 = vsyncpa [#allocation5], 0  ;;  %s1185_s0 = inlined_call_operand.vmem [shape: f32[2,4,256], index: 0, kind: input, shape index: {}]   ;;  %s1186_s1 = inlined_call_operand.vmem [shape: bf16[3,16,4], index: 1, kind: input, shape index: {}]   ;;  %s1187_s2 = inlined_call_operand.vmem [shape: bf16[3,8,8], index: 2, kind: input, shape index: {}]   ;;  %s1188_s3 = inlined_call_operand.hbm [shape: f32[8,8], index: 3, kind: input, shape index: {}]   ;;  %s1189_s4 = inlined_call_operand.hbm [shape: f32[2,8,256], index: 4, kind: output, shape index: {}]  }
   0x1   :  { %10 = vsyncpa [#allocation6], 0  ;;  %s22_s17 = sshll.u32 %s1188_s3, 4  ;;  %s952_s18 = smov [#allocation4]   ;;  %s23_s17 = int_to_ptr.hbm [resolvable:$true] %s22_s17 }
   0x2   :  { %s24_s19 = sshll.u32 %s952_s18, 4  ;;  %s25_s19 = int_to_ptr.vmem [resolvable:$true] %s24_s19 }
   0x3   :  { %27 = dma.hbm_to_vmem [thread:$0]  %s23_s17, 128, %s25_s19, [#allocation5]  }
   0x4   :  { %948 = dma.done.wait [#allocation5], 128  }
   0x5   :  { %949 = vsyncadd [#allocation5], 4294967168  ;;  %v953_v0 = vmov 0   ;;  %v42_v1 = vld [vmem:[%s1185_s0] sm:$0xff]  ;;  %vm52_vm0 = vcmask 1041408   ;;  %s954_s3 = smov 2  }
   0x6   :  { %37 = vst [vmem:[#allocation2] sm:$0x3] %v953_v0  ;;  %892 = vset.pattern.permute.xlu0 %v953_v0  ;;  %s955_s22 = smov 4   ;;  %v842_v17 = vld [vmem:[%s1185_s0 + $0x8] sm:$0xff]  ;;  %vm86_vm1 = vcmask 31744   ;;  %v873_v25 = vld [vmem:[%s1186_s1] sm:$0xff] }
   0x7   :  { %38 = vst [vmem:[#allocation2 + $0x6] sm:$0x3] %v953_v0  ;;  %v1012_v28 = vld [vmem:[#allocation4] sm:$0xff]  ;;  %v956_v31 = vmov 1   ;;  %v957_v32 = vmov 2   ;;  %vm83_vm2 = vcmask 15360  }
   0x8   :  { %39 = vst [vmem:[#allocation3] sm:$0xf] %v953_v0  ;;  %893 = vset.pattern.permute.xlu1 %v956_v31  ;;  %894 = vset.pattern.permute.xlu2 %v957_v32  ;;  %v874_v42 = vld [vmem:[%s1186_s1 + $0x8] sm:$0xff]  ;;  %v875_v45 = vld [vmem:[%s1186_s1 + $0x10] sm:$0xff]  ;;  %vm288_vm3 = vcmask 1043456   ;;  %vm284_vm4 = vcmask 64512  }
   0x9   :  { %40 = vst [vmem:[#allocation3 + $0xc] sm:$0xf] %v953_v0  ;;  %s799_s23 = sshll.u32 %s1189_s4, 4  ;;  %s963_s24 = smov 256   ;;  %s800_s23 = int_to_ptr.hbm [resolvable:$true] %s799_s23 }
   0xa   :  { %44 = vst [vmem:[#allocation1] ss:$2 sm:$0xff] %v42_v1  ;;  %s964_s25 = smov 16  }
  0x11   :  { %v45_v2 = vld.sshfl [vmem:[#allocation1] sm:$0xff pattern:$0x75316420]  ;;  %v46_v3 = vld.sshfl [vmem:[#allocation1 + $0x8] sm:$0xff pattern:$0x75316420] }
  0x12   :  { %v49_v4 = vpack.c.bf16 %v46_v3, %v45_v2 }
  0x14   :  { %v51_v5 = vrot.slane %v49_v4, 2 }
  0x16   :  { %v55_v6 = vsel %vm52_vm0, %v49_v4, %v51_v5 }
  0x17   :  { %57 = vst [vmem:[#allocation2 + $0x2] sm:$0xf] %v55_v6 }
  0x1e   :  { %v60_v7 = vld [vmem:[#allocation2] sm:$0x3f] }
  0x1f   :  { %70 = vst [vmem:[#allocation1] ss:$4 sm:$0xff] %v60_v7  ;;  %v185_v11 = vld [vmem:[#allocation2 + $0x2] sm:$0xf] }
  0x26   :  { %v75_v8 = vld.sshfl [vmem:[#allocation1 + $0x10] sm:$0xff pattern:$0x73625140]  ;;  %v71_v9 = vld.sshfl [vmem:[#allocation1] sm:$0xff pattern:$0x73625140] }
  0x27   :  { %81 = vrot.lane.b32.xlu1 %v75_v8, %s954_s3  ;;  %77 = vrot.lane.b32.xlu0 %v71_v9, %s954_s3  ;;  %v73_v10 = vld.sshfl [vmem:[#allocation1 + $0x8] sm:$0xff pattern:$0x73625140] }
  0x28   :  { %129 = vst [vmem:[#allocation1] ss:$4 sm:$0xff] %v60_v7 }
  0x2f   :  { %79 = vrot.lane.b32.xlu0 %v73_v10, %s954_s3  ;;  %v130_v12 = vld.sshfl [vmem:[#allocation1] sm:$0xff pattern:$0x73625140]  ;;  %v132_v13 = vld.sshfl [vmem:[#allocation1 + $0x8] sm:$0xff pattern:$0x73625140] }
  0x30   :  { %136 = vrot.lane.b32.xlu1 %v130_v12, %s955_s22  ;;  %138 = vrot.lane.b32.xlu2 %v132_v13, %s955_s22  ;;  %v134_v14 = vld.sshfl [vmem:[#allocation1 + $0x10] sm:$0xff pattern:$0x73625140] }
  0x31   :  { %192 = vst [vmem:[#allocation1] ss:$4 sm:$0xff] %v185_v11 }
  0x37   :  { %242 = vperm.xlu0 %892, %v1012_v28  }
  0x38   :  { %140 = vrot.lane.b32.xlu2 %v134_v14, %s955_s22  ;;  %v193_v15 = vld.sshfl [vmem:[#allocation1] sm:$0xff pattern:$0x73625140]  ;;  %v194_v16 = vld.sshfl [vmem:[#allocation1 + $0x8] sm:$0xff pattern:$0x73625140]  ;;  %250 = vperm.xlu1 %893, %v1012_v28  }
  0x39   :  { %438 = vst [vmem:[#allocation1] ss:$2 sm:$0xff] %v842_v17  ;;  %v198_v38 = vsel %vm52_vm0, %v193_v15, 0  ;;  %v200_v43 = vsel %vm52_vm0, %v194_v16, 0 }
  0x40   :  { %v439_v19 = vld.sshfl [vmem:[#allocation1] sm:$0xff pattern:$0x75316420]  ;;  %v440_v20 = vld.sshfl [vmem:[#allocation1 + $0x8] sm:$0xff pattern:$0x75316420]  ;;  %256 = vperm.xlu2 %894, %v1012_v28  }
  0x41   :  { %v443_v22 = vpack.c.bf16 %v440_v20, %v439_v19 }
  0x43   :  { %v445_v26 = vrot.slane %v443_v22, 2 }
  0x45   :  { %v448_v27 = vsel %vm52_vm0, %v443_v22, %v445_v26 }
  0x46   :  { %451 = vst [vmem:[#allocation2 + $0x8] sm:$0xf] %v448_v27 }
  0x4d   :  { %v454_v33 = vld [vmem:[#allocation2 + $0x6] sm:$0x3f] }
  0x4e   :  { %463 = vst [vmem:[#allocation1] ss:$4 sm:$0xff] %v454_v33  ;;  %v574_v9 = vld [vmem:[#allocation2 + $0x8] sm:$0xf] }
  0x55   :  { %v466_v1 = vld.sshfl [vmem:[#allocation1 + $0x8] sm:$0xff pattern:$0x73625140]  ;;  %v468_v4 = vld.sshfl [vmem:[#allocation1 + $0x10] sm:$0xff pattern:$0x73625140] }
  0x56   :  { %v464_v7 = vld.sshfl [vmem:[#allocation1] sm:$0xff pattern:$0x73625140] }
  0x57   :  { %520 = vst [vmem:[#allocation1] ss:$4 sm:$0xff] %v454_v33 }
  0x5e   :  { %v525_v10 = vld.sshfl [vmem:[#allocation1 + $0x10] sm:$0xff pattern:$0x73625140]  ;;  %v521_v11 = vld.sshfl [vmem:[#allocation1] sm:$0xff pattern:$0x73625140] }
  0x5f   :  { %v523_v12 = vld.sshfl [vmem:[#allocation1 + $0x8] sm:$0xff pattern:$0x73625140] }
  0x60   :  { %581 = vst [vmem:[#allocation1] ss:$4 sm:$0xff] %v574_v9 }
  0x8a   :  { %v139_v18 = vpop.permute.xlu2 %138 }
  0x92   :  { %v141_v21 = vpop.permute.xlu2 %140 }
  0x93   :  { %v144_v23 = vsel %vm86_vm1, %v139_v18, %v141_v21 }
  0x94   :  { %v152_v24 = vsel %vm52_vm0, %v144_v23, 0 }
  0x95   :  { %175 = vmatpush.bf16.msra.mxu3 %v152_v24 }
  0x98   :  { %825 = vmatmul.msk.bf16.vlgmr.msra.gmra.mxu3 %vm86_vm1, %v873_v25 }
  0x99   :  { %v82_v29 = vpop.permute.xlu1 %81  ;;  %v78_v30 = vpop.permute.xlu0 %77 }
  0x9a   :  { %v1047_v0 = vpop.permute.xlu2 %256 }
  0xa1   :  { %v80_v34 = vpop.permute.xlu0 %79 }
  0xa2   :  { %v137_v35 = vpop.permute.xlu1 %136  ;;  %v84_v36 = vsel %vm83_vm2, %v78_v30, %v80_v34  ;;  %v85_v37 = vsel %vm83_vm2, %v80_v34, %v82_v29  ;;  %v834_v34 = vld [vmem:[%s1187_s2 + $0x4] sm:$0xf] }
  0xa3   :  { %v91_v39 = vsel %vm52_vm0, %v84_v36, 0  ;;  %v94_v40 = vsel %vm52_vm0, %v85_v37, 0  ;;  %v143_v41 = vsel %vm86_vm1, %v137_v35, %v139_v18 }
  0xa4   :  { %103 = vmatpush.bf16.msra.mxu0 %v91_v39  ;;  %117 = vmatpush.bf16.msra.mxu1 %v94_v40  ;;  %v149_v44 = vsel %vm52_vm0, %v143_v41, 0 }
  0xa5   :  { %161 = vmatpush.bf16.msra.mxu2 %v149_v44 }
  0xa7   :  { %818 = vmatmul.msk.bf16.vlgmr.msra.gmra.mxu0 %vm86_vm1, %v874_v42  ;;  %819 = vmatmul.msk.bf16.vlgmr.msra.gmra.mxu1 %vm86_vm1, %v874_v42 }
  0xa8   :  { %209 = vmatpush.bf16.msrb.mxu0 %v198_v38  ;;  %223 = vmatpush.bf16.msrb.mxu1 %v200_v43  ;;  %v263_v43 = vld [vmem:[%s1187_s2] sm:$0xf] }
  0xa9   :  { %824 = vmatmul.msk.bf16.vlgmr.msra.gmra.mxu2 %vm86_vm1, %v873_v25  ;;  %v1041_v54 = vpop.permute.xlu0 %242 }
  0xaa   :  { %v1045_v61 = vpop.permute.xlu1 %250 }
  0xb7   :  { %832 = vmatmul.msk.bf16.vlgmr.msrb.gmra.mxu0 %vm86_vm1, %v875_v45  ;;  %833 = vmatmul.msk.bf16.vlgmr.msrb.gmra.mxu1 %vm86_vm1, %v875_v45  ;;  %v583_v45 = vld.sshfl [vmem:[#allocation1 + $0x8] sm:$0xff pattern:$0x73625140] }
 0x11b   :  { %v177_v50 = vpop.f32.mrf.mxu3 }
 0x124   :  { %v105_v46 = vpop.f32.mrf.mxu0  ;;  %v119_v47 = vpop.f32.mrf.mxu1 }
 0x125   :  { %v178_v52 = vadd.f32 %v177_v50, %v119_v47 }
 0x12c   :  { %v1037_v48 = vpop.f32.mrf.mxu0  ;;  %v1039_v49 = vpop.f32.mrf.mxu1 }
 0x12d   :  { %v163_v51 = vpop.f32.mrf.mxu2 }
 0x12e   :  { %v164_v53 = vadd.f32 %v163_v51, %v105_v46  ;;  %v582_v46 = vld.sshfl [vmem:[#allocation1] sm:$0xff pattern:$0x73625140] }
 0x134   :  { %v211_v55 = vpop.f32.mrf.mxu0  ;;  %v225_v56 = vpop.f32.mrf.mxu1 }
 0x135   :  { %v230_v57 = vadd.f32 %v211_v55, %v164_v53  ;;  %v231_v58 = vadd.f32 %v225_v56, %v178_v52  ;;  %v589_v52 = vsel %vm52_vm0, %v583_v45, 0  ;;  %v587_v56 = vsel %vm52_vm0, %v582_v46, 0 }
 0x137   :  { %v245_v59 = vadd.f32 %v1041_v54, %v230_v57  ;;  %v246_v60 = vadd.f32 %v1041_v54, %v231_v58  ;;  %v839_v57 = vld [vmem:[%s1187_s2 + $0x8] sm:$0xf] }
 0x139   :  { %v247_v62 = vmax.f32 %v245_v59, 0.0  ;;  %v248_v63 = vmax.f32 %v246_v60, 0.0 }
 0x13b   :  { %v253_v2 = vmul.f32 %v1045_v61, %v247_v62  ;;  %v254_v3 = vmul.f32 %v1045_v61, %v248_v63 }
 0x13c   :  { %v1119_v9 = vpop.f32.mrf.mxu1 }
 0x13d   :  { %v259_v5 = vadd.f32 %v1047_v0, %v253_v2  ;;  %v260_v6 = vadd.f32 %v1047_v0, %v254_v3 }
 0x13f   :  { %v261_v8 = vpack.c.bf16 %v260_v6, %v259_v5  ;;  %v876_v5 = vld [vmem:[%s1186_s1] sm:$0xff]  ;;  %v878_v6 = vld [vmem:[%s1186_s1 + $0x10] sm:$0xff] }
 0x141   :  { %262 = vst [vmem:[#allocation3 + $0x4] sm:$0xff] %v261_v8  ;;  %v369_v22 = vunpack.c.h.b16 %v261_v8  ;;  %v368_v23 = vunpack.c.l.b16 %v261_v8  ;;  %v1117_v8 = vpop.f32.mrf.mxu2 }
 0x143   :  { %v371_v24 = vpack.c.b16 %v369_v22, %v369_v22  ;;  %v370_v26 = vpack.c.b16 %v368_v23, %v368_v23 }
 0x145   :  { %v379_v33 = vsel %vm288_vm3, %v371_v24, 0  ;;  %v376_v36 = vsel %vm288_vm3, %v370_v26, 0 }
 0x148   :  { %v265_v13 = vld [vmem:[#allocation3 + $0x8] sm:$0xf]  ;;  %v264_v14 = vld [vmem:[#allocation3] sm:$0xff] }
 0x149   :  { %v272_v15 = vunpack.c.l.b16 %v265_v13  ;;  %v271_v16 = vunpack.c.h.b16 %v264_v14  ;;  %v270_v17 = vunpack.c.l.b16 %v264_v14 }
 0x14b   :  { %v275_v18 = vpack.c.b16 %v272_v15, %v272_v15  ;;  %v274_v19 = vpack.c.b16 %v271_v16, %v271_v16  ;;  %v273_v20 = vpack.c.b16 %v270_v17, %v270_v17 }
 0x14d   :  { %280 = vrot.lane.b32.xlu0 %v275_v18, %s954_s3  ;;  %278 = vrot.lane.b32.xlu2 %v274_v19, %s954_s3 }
 0x14e   :  { %276 = vrot.lane.b32.xlu1 %v273_v20, %s954_s3 }
 0x155   :  { %325 = vrot.lane.b32.xlu0 %v275_v18, %s955_s22  ;;  %323 = vrot.lane.b32.xlu2 %v274_v19, %s955_s22 }
 0x156   :  { %321 = vrot.lane.b32.xlu1 %v273_v20, %s955_s22 }
 0x15d   :  { %474 = vrot.lane.b32.xlu0 %v468_v4, %s954_s3  ;;  %472 = vrot.lane.b32.xlu2 %v466_v1, %s954_s3  ;;  %v877_v1 = vld [vmem:[%s1186_s1 + $0x8] sm:$0xff] }
 0x15e   :  { %470 = vrot.lane.b32.xlu1 %v464_v7, %s954_s3  ;;  %v1115_v7 = vpop.f32.mrf.mxu3 }
 0x165   :  { %531 = vrot.lane.b32.xlu0 %v525_v10, %s955_s22  ;;  %529 = vrot.lane.b32.xlu2 %v523_v12, %s955_s22  ;;  %v1121_v10 = vpop.f32.mrf.mxu0 }
 0x166   :  { %527 = vrot.lane.b32.xlu1 %v521_v11, %s955_s22 }
 0x1a7   :  { %v279_v21 = vpop.permute.xlu2 %278 }
 0x1af   :  { %v324_v35 = vpop.permute.xlu2 %323 }
 0x1b7   :  { %v473_v44 = vpop.permute.xlu2 %472 }
 0x1bf   :  { %v281_v25 = vpop.permute.xlu0 %280  ;;  %v530_v59 = vpop.permute.xlu2 %529 }
 0x1c0   :  { %v277_v27 = vpop.permute.xlu1 %276  ;;  %v283_v29 = vsel %vm83_vm2, %v279_v21, %v281_v25 }
 0x1c1   :  { %v282_v30 = vsel %vm83_vm2, %v277_v27, %v279_v21  ;;  %v293_v31 = vsel %vm288_vm3, %v283_v29, 0 }
 0x1c2   :  { %v290_v32 = vsel %vm288_vm3, %v282_v30, 0  ;;  %315 = vmatpush.bf16.msrb.mxu3 %v293_v31 }
 0x1c3   :  { %302 = vmatpush.bf16.msrb.mxu2 %v290_v32 }
 0x1c5   :  { %836 = vmatmul.msk.bf16.vlgmr.msrb.gmra.mxu3 %vm284_vm4, %v834_v34 }
 0x1c6   :  { %401 = vmatpush.bf16.msra.mxu3 %v379_v33  ;;  %835 = vmatmul.msk.bf16.vlgmr.msrb.gmra.mxu2 %vm284_vm4, %v834_v34 }
 0x1c7   :  { %388 = vmatpush.bf16.msra.mxu2 %v376_v36  ;;  %v326_v37 = vpop.permute.xlu0 %325 }
 0x1c8   :  { %v328_v38 = vsel %vm86_vm1, %v324_v35, %v326_v37  ;;  %v322_v39 = vpop.permute.xlu1 %321 }
 0x1c9   :  { %v336_v40 = vsel %vm288_vm3, %v328_v38, 0  ;;  %v327_v41 = vsel %vm86_vm1, %v322_v39, %v324_v35 }
 0x1ca   :  { %v333_v42 = vsel %vm288_vm3, %v327_v41, 0  ;;  %358 = vmatpush.bf16.msra.mxu1 %v336_v40 }
 0x1cb   :  { %345 = vmatpush.bf16.msra.mxu0 %v333_v42  ;;  %v958_v42 = vmov 6  }
 0x1cc   :  { %897 = vset.pattern.permute.xlu0 %v958_v42 }
 0x1cd   :  { %838 = vmatmul.msk.bf16.vlgmr.msra.gmra.mxu1 %vm284_vm4, %v263_v43 }
 0x1ce   :  { %837 = vmatmul.msk.bf16.vlgmr.msra.gmra.mxu0 %vm284_vm4, %v263_v43  ;;  %v959_v43 = vmov 3  }
 0x1cf   :  { %v475_v47 = vpop.permute.xlu0 %474  ;;  %895 = vset.pattern.permute.xlu1 %v959_v43 }
 0x1d0   :  { %v477_v50 = vsel %vm83_vm2, %v473_v44, %v475_v47  ;;  %v471_v51 = vpop.permute.xlu1 %470 }
 0x1d1   :  { %v485_v53 = vsel %vm52_vm0, %v477_v50, 0  ;;  %v476_v55 = vsel %vm83_vm2, %v471_v51, %v473_v44 }
 0x1d2   :  { %v482_v58 = vsel %vm52_vm0, %v476_v55, 0  ;;  %508 = vmatpush.bf16.msrb.mxu1 %v485_v53 }
 0x1d3   :  { %494 = vmatpush.bf16.msrb.mxu0 %v482_v58 }
 0x1d5   :  { %841 = vmatmul.msk.bf16.vlgmr.msra.gmra.mxu3 %vm284_vm4, %v839_v57 }
 0x1d6   :  { %612 = vmatpush.bf16.msra.mxu1 %v589_v52  ;;  %840 = vmatmul.msk.bf16.vlgmr.msra.gmra.mxu2 %vm284_vm4, %v839_v57 }
 0x1d7   :  { %598 = vmatpush.bf16.msra.mxu0 %v587_v56  ;;  %v532_v60 = vpop.permute.xlu0 %531  ;;  %v960_v56 = vmov 4  }
 0x1d8   :  { %v534_v62 = vsel %vm86_vm1, %v530_v59, %v532_v60  ;;  %v528_v63 = vpop.permute.xlu1 %527  ;;  %896 = vset.pattern.permute.xlu2 %v960_v56 }
 0x1d9   :  { %v542_v2 = vsel %vm52_vm0, %v534_v62, 0  ;;  %v533_v3 = vsel %vm86_vm1, %v528_v63, %v530_v59 }
 0x1da   :  { %v539_v4 = vsel %vm52_vm0, %v533_v3, 0  ;;  %565 = vmatpush.bf16.msrb.mxu3 %v542_v2 }
 0x1db   :  { %551 = vmatpush.bf16.msrb.mxu2 %v539_v4 }
 0x1dd   :  { %850 = vmatmul.msk.bf16.vlgmr.msrb.gmra.mxu1 %vm86_vm1, %v877_v1 }
 0x1de   :  { %849 = vmatmul.msk.bf16.vlgmr.msrb.gmra.mxu0 %vm86_vm1, %v877_v1 }
 0x1e5   :  { %856 = vmatmul.msk.bf16.vlgmr.msrb.gmra.mxu3 %vm86_vm1, %v876_v5 }
 0x1e6   :  { %855 = vmatmul.msk.bf16.vlgmr.msrb.gmra.mxu2 %vm86_vm1, %v876_v5 }
 0x1ed   :  { %864 = vmatmul.msk.bf16.vlgmr.msra.gmra.mxu1 %vm86_vm1, %v878_v6 }
 0x1ee   :  { %863 = vmatmul.msk.bf16.vlgmr.msra.gmra.mxu0 %vm86_vm1, %v878_v6 }
 0x248   :  { %v317_v11 = vpop.f32.mrf.mxu3 }
 0x249   :  { %v304_v12 = vpop.f32.mrf.mxu2 }
 0x24a   :  { %v360_v13 = vpop.f32.mrf.mxu1 }
 0x24b   :  { %v347_v14 = vpop.f32.mrf.mxu0  ;;  %v361_v15 = vadd.f32 %v360_v13, %v317_v11 }
 0x24c   :  { %v348_v16 = vadd.f32 %v347_v14, %v304_v12 }
 0x250   :  { %v319_v17 = vpop.f32.mrf.mxu3 }
 0x251   :  { %v306_v18 = vpop.f32.mrf.mxu2 }
 0x252   :  { %v362_v19 = vpop.f32.mrf.mxu1 }
 0x253   :  { %v349_v20 = vpop.f32.mrf.mxu0 }
 0x258   :  { %v403_v21 = vpop.f32.mrf.mxu3 }
 0x259   :  { %v390_v22 = vpop.f32.mrf.mxu2  ;;  %v1123_v23 = vadd.f32 %v403_v21, %v361_v15 }
 0x25a   :  { %v1125_v24 = vadd.f32 %v390_v22, %v348_v16  ;;  %v510_v25 = vpop.f32.mrf.mxu1 }
 0x25b   :  { %v496_v26 = vpop.f32.mrf.mxu0 }
 0x260   :  { %v405_v27 = vpop.f32.mrf.mxu3 }
 0x261   :  { %v392_v29 = vpop.f32.mrf.mxu2 }
 0x262   :  { %v1127_v30 = vpop.f32.mrf.mxu1 }
 0x263   :  { %v1129_v31 = vpop.f32.mrf.mxu0 }
 0x268   :  { %v567_v32 = vpop.f32.mrf.mxu3 }
 0x269   :  { %v553_v33 = vpop.f32.mrf.mxu2  ;;  %v568_v34 = vadd.f32 %v567_v32, %v510_v25  ;;  %v636_v32 = vld [vmem:[%s1187_s2] sm:$0xf] }
 0x26a   :  { %v554_v35 = vadd.f32 %v553_v33, %v496_v26  ;;  %v614_v36 = vpop.f32.mrf.mxu1 }
 0x26b   :  { %v600_v37 = vpop.f32.mrf.mxu0  ;;  %v620_v38 = vadd.f32 %v614_v36, %v568_v34 }
 0x26c   :  { %v619_v39 = vadd.f32 %v600_v37, %v554_v35 }
 0x26d   :  { %v626_v40 = vadd.f32 %v620_v38, %v1041_v54 }
 0x26e   :  { %v625_v41 = vadd.f32 %v619_v39, %v1041_v54 }
 0x26f   :  { %v628_v44 = vmax.f32 %v626_v40, 0.0 }
 0x270   :  { %v627_v45 = vmax.f32 %v625_v41, 0.0  ;;  %v569_v17 = vpop.f32.mrf.mxu3  ;;  %v870_v41 = vld [vmem:[%s1187_s2 + $0x8] sm:$0xf] }
 0x271   :  { %v630_v46 = vmul.f32 %v628_v44, %v1045_v61  ;;  %v555_v16 = vpop.f32.mrf.mxu2  ;;  %v570_v27 = vadd.f32 %v569_v17, %v1127_v30 }
 0x272   :  { %v629_v47 = vmul.f32 %v627_v45, %v1045_v61  ;;  %v961_v61 = vmov 5   ;;  %v556_v26 = vadd.f32 %v555_v16, %v1129_v31  ;;  %v616_v34 = vpop.f32.mrf.mxu1  ;;  %v180_v45 = vadd.f32 %v1115_v7, %v1039_v49 }
 0x273   :  { %v632_v50 = vadd.f32 %v630_v46, %v1047_v0  ;;  %v602_v33 = vpop.f32.mrf.mxu0  ;;  %v622_v36 = vadd.f32 %v616_v34, %v570_v27  ;;  %v166_v46 = vadd.f32 %v1117_v8, %v1037_v48 }
 0x274   :  { %v631_v51 = vadd.f32 %v629_v47, %v1047_v0  ;;  %v621_v35 = vadd.f32 %v602_v33, %v556_v26 }
 0x276   :  { %v633_v52 = vpack.c.bf16 %v632_v50, %v631_v51 }
 0x278   :  { %635 = vst [vmem:[#allocation3 + $0x10] sm:$0xff] %v633_v52  ;;  %v738_v0 = vunpack.c.h.b16 %v633_v52  ;;  %v737_v63 = vunpack.c.l.b16 %v633_v52 }
 0x27a   :  { %v740_v2 = vpack.c.b16 %v738_v0, %v738_v0  ;;  %v739_v4 = vpack.c.b16 %v737_v63, %v737_v63 }
 0x27c   :  { %v748_v14 = vsel %vm288_vm3, %v740_v2, 0  ;;  %v745_v15 = vsel %vm288_vm3, %v739_v4, 0 }
 0x27f   :  { %v638_v53 = vld [vmem:[#allocation3 + $0x14] sm:$0xf]  ;;  %v637_v55 = vld [vmem:[#allocation3 + $0xc] sm:$0xff] }
 0x280   :  { %v644_v54 = vunpack.c.l.b16 %v638_v53  ;;  %v643_v57 = vunpack.c.h.b16 %v637_v55  ;;  %v642_v58 = vunpack.c.l.b16 %v637_v55 }
 0x282   :  { %v647_v59 = vpack.c.b16 %v644_v54, %v644_v54  ;;  %v646_v60 = vpack.c.b16 %v643_v57, %v643_v57  ;;  %v645_v62 = vpack.c.b16 %v642_v58, %v642_v58 }
 0x284   :  { %652 = vrot.lane.b32.xlu0 %v647_v59, %s954_s3  ;;  %650 = vrot.lane.b32.xlu2 %v646_v60, %s954_s3 }
 0x285   :  { %648 = vrot.lane.b32.xlu1 %v645_v62, %s954_s3 }
 0x28c   :  { %695 = vrot.lane.b32.xlu0 %v647_v59, %s955_s22  ;;  %693 = vrot.lane.b32.xlu2 %v646_v60, %s955_s22 }
 0x28d   :  { %691 = vrot.lane.b32.xlu1 %v645_v62, %s955_s22 }
 0x294   :  { %236 = vperm.xlu0 %897, %v1012_v28   ;;  %418 = vperm.xlu2 %896, %v1012_v28  }
 0x295   :  { %410 = vperm.xlu1 %895, %v1012_v28  }
 0x29c   :  { %899 = vset.pattern.permute.xlu0 %v961_v61 }
 0x29d   :  { %898 = vset.pattern.permute.xlu1 %v961_v61 }
 0x29e   :  { %424 = vperm.xlu1 %898, %v1012_v28   ;;  %v865_v28 = vld [vmem:[%s1187_s2 + $0x4] sm:$0xf]  ;;  %s962_s2 = smov [#allocation7]  }
 0x29f   :  { %s797_s21 = sshll.u32 %s962_s2, 4  ;;  %s798_s21 = int_to_ptr.vmem [resolvable:$true] %s797_s21 }
 0x2de   :  { %v651_v1 = vpop.permute.xlu2 %650 }
 0x2e6   :  { %v694_v18 = vpop.permute.xlu2 %693 }
 0x2ee   :  { %v419_v44 = vpop.permute.xlu2 %418 }
 0x2f6   :  { %v653_v3 = vpop.permute.xlu0 %652 }
 0x2f7   :  { %v655_v5 = vsel %vm83_vm2, %v651_v1, %v653_v3  ;;  %v649_v6 = vpop.permute.xlu1 %648 }
 0x2f8   :  { %v663_v11 = vsel %vm288_vm3, %v655_v5, 0  ;;  %v654_v12 = vsel %vm83_vm2, %v649_v6, %v651_v1 }
 0x2f9   :  { %v660_v13 = vsel %vm288_vm3, %v654_v12, 0  ;;  %685 = vmatpush.bf16.msra.mxu3 %v663_v11 }
 0x2fa   :  { %672 = vmatpush.bf16.msra.mxu2 %v660_v13 }
 0x2fc   :  { %867 = vmatmul.msk.bf16.vlgmr.msra.gmra.mxu3 %vm284_vm4, %v865_v28 }
 0x2fd   :  { %770 = vmatpush.bf16.msrb.mxu3 %v748_v14  ;;  %866 = vmatmul.msk.bf16.vlgmr.msra.gmra.mxu2 %vm284_vm4, %v865_v28 }
 0x2fe   :  { %757 = vmatpush.bf16.msrb.mxu2 %v745_v15  ;;  %v696_v19 = vpop.permute.xlu0 %695 }
 0x2ff   :  { %v698_v20 = vsel %vm86_vm1, %v694_v18, %v696_v19  ;;  %v692_v21 = vpop.permute.xlu1 %691 }
 0x300   :  { %v706_v22 = vsel %vm288_vm3, %v698_v20, 0  ;;  %v697_v25 = vsel %vm86_vm1, %v692_v21, %v694_v18 }
 0x301   :  { %v703_v29 = vsel %vm288_vm3, %v697_v25, 0  ;;  %728 = vmatpush.bf16.msrb.mxu1 %v706_v22 }
 0x302   :  { %715 = vmatpush.bf16.msrb.mxu0 %v703_v29 }
 0x304   :  { %869 = vmatmul.msk.bf16.vlgmr.msrb.gmra.mxu1 %vm284_vm4, %v636_v32 }
 0x305   :  { %868 = vmatmul.msk.bf16.vlgmr.msrb.gmra.mxu0 %vm284_vm4, %v636_v32 }
 0x306   :  { %v237_v37 = vpop.permute.xlu0 %236 }
 0x307   :  { %v623_v31 = vadd.f32 %v621_v35, %v237_v37  ;;  %v624_v38 = vadd.f32 %v622_v36, %v237_v37  ;;  %v411_v30 = vpop.permute.xlu1 %410 }
 0x308   :  { %v413_v39 = vadd.f32 %v411_v30, %v1125_v24  ;;  %v414_v40 = vadd.f32 %v411_v30, %v1123_v23  ;;  %v232_v24 = vadd.f32 %v1121_v10, %v166_v46  ;;  %v233_v23 = vadd.f32 %v1119_v9, %v180_v45 }
 0x30a   :  { %v415_v42 = vmax.f32 %v413_v39, 0.0  ;;  %v416_v43 = vmax.f32 %v414_v40, 0.0  ;;  %v239_v52 = vadd.f32 %v237_v37, %v232_v24  ;;  %v240_v53 = vadd.f32 %v237_v37, %v233_v23 }
 0x30c   :  { %872 = vmatmul.msk.bf16.vlgmr.msrb.gmra.mxu3 %vm284_vm4, %v870_v41  ;;  %v421_v47 = vmul.f32 %v419_v44, %v415_v42  ;;  %v422_v50 = vmul.f32 %v419_v44, %v416_v43 }
 0x30d   :  { %871 = vmatmul.msk.bf16.vlgmr.msrb.gmra.mxu2 %vm284_vm4, %v870_v41 }
 0x310   :  { %v425_v51 = vpop.permute.xlu1 %424 }
 0x311   :  { %v427_v55 = vadd.f32 %v425_v51, %v421_v47  ;;  %v428_v56 = vadd.f32 %v425_v51, %v422_v50 }
 0x313   :  { %v429_v54 = vadd.f32 %v427_v55, %v239_v52  ;;  %v430_v57 = vadd.f32 %v428_v56, %v240_v53 }
 0x315   :  { %v431_v58 = vmax.f32 %v429_v54, 0.0  ;;  %v432_v49 = vmax.f32 %v430_v57, 0.0 }
 0x317   :  { %433 = vst [vmem:[#allocation7] sm:$0xff] %v431_v58 }
 0x318   :  { %434 = vst [vmem:[#allocation7 + $0x8] sm:$0xff] %v432_v49 }
 0x37f   :  { %v687_v48 = vpop.f32.mrf.mxu3 }
 0x380   :  { %v674_v7 = vpop.f32.mrf.mxu2 }
 0x381   :  { %v730_v8 = vpop.f32.mrf.mxu1 }
 0x382   :  { %v717_v59 = vpop.f32.mrf.mxu0  ;;  %v731_v61 = vadd.f32 %v730_v8, %v687_v48 }
 0x383   :  { %v718_v0 = vadd.f32 %v717_v59, %v674_v7 }
 0x387   :  { %v689_v10 = vpop.f32.mrf.mxu3 }
 0x388   :  { %v676_v60 = vpop.f32.mrf.mxu2 }
 0x389   :  { %v732_v9 = vpop.f32.mrf.mxu1 }
 0x38a   :  { %v719_v62 = vpop.f32.mrf.mxu0 }
 0x38f   :  { %v772_v63 = vpop.f32.mrf.mxu3 }
 0x390   :  { %v759_v1 = vpop.f32.mrf.mxu2  ;;  %v777_v2 = vadd.f32 %v772_v63, %v731_v61 }
 0x391   :  { %v776_v3 = vadd.f32 %v759_v1, %v718_v0 }
 0x392   :  { %v779_v4 = vadd.f32 %v777_v2, %v411_v30 }
 0x393   :  { %v778_v5 = vadd.f32 %v776_v3, %v411_v30 }
 0x394   :  { %v781_v6 = vmax.f32 %v779_v4, 0.0 }
 0x395   :  { %v780_v11 = vmax.f32 %v778_v5, 0.0 }
 0x396   :  { %v783_v12 = vmul.f32 %v781_v6, %v419_v44 }
 0x397   :  { %v782_v13 = vmul.f32 %v780_v11, %v419_v44  ;;  %v774_v14 = vpop.f32.mrf.mxu3 }
 0x398   :  { %v785_v28 = vadd.f32 %v783_v12, %v425_v51  ;;  %v761_v15 = vpop.f32.mrf.mxu2 }
 0x399   :  { %v784_v16 = vadd.f32 %v782_v13, %v425_v51 }
 0x39a   :  { %v787_v17 = vadd.f32 %v785_v28, %v624_v38 }
 0x39b   :  { %v786_v18 = vadd.f32 %v784_v16, %v623_v31 }
 0x39c   :  { %v789_v19 = vmax.f32 %v787_v17, 0.0 }
 0x39d   :  { %v788_v20 = vmax.f32 %v786_v18, 0.0 }
 0x39e   :  { %792 = vst [vmem:[#allocation7 + $0x18] sm:$0xff] %v789_v19 }
 0x39f   :  { %791 = vst [vmem:[#allocation7 + $0x10] sm:$0xff] %v788_v20 }
 0x3a0   :  { %805 = dma.vmem_to_hbm [thread:$0]  %s798_s21, 512, %s800_s23, [#allocation6], %s963_s24, %s963_s24, %s964_s25  }
 0x3a1   :  { %950 = dma.done.wait [#allocation6], 512  }
 0x3a2   :  { %951 = vsyncadd [#allocation6], 4294966784 }
 0x3a3   :  { %810 = vsyncpa [#allocation5], 1 }
 0x3a4   :  { %811 = vsyncpa [#allocation6], 1 }

</bundles_post_ra>
